<compile_context>
chip_gen: v6e
topology: v6e:2x2x1
jax: 0.10.0
libtpu: 0.0.40
codegen_flags: <defaults>
</compile_context>

<pallas_src>
import functools

import jax
import jax.numpy as jnp
from jax.experimental import pallas as pl
from jax.experimental.pallas import tpu as pltpu

_LANE = 128
_ROW_TILE_CAP = 1024                 # multiple of 8/16/32 -> dense sublanes for any dtype
_MIN_PALLAS_BYTES = 1 << 20          # below this, launch overhead dwarfs the work


# ---------------------------------------------------------------------------
# pe buffer construction (plain JAX glue, matches the PyTorch __init__ exactly)
# ---------------------------------------------------------------------------
def make_position_encoding(d_model: int, max_len: int = 128, dtype=jnp.float32):
    """Builds the pe buffer exactly as the PyTorch __init__ does."""
    assert d_model % 2 == 0, "d_model must be even (matches 0::2 / 1::2 fill)"
    position = jnp.arange(0, max_len, dtype=jnp.float32)[:, None]                   # (L, 1)
    div_term = 10000.0 ** (jnp.arange(0, d_model, 2, dtype=jnp.float32) / d_model)  # (D/2,)
    angles = position / div_term                                                    # (L, D/2)
    pe = jnp.stack([jnp.sin(angles), jnp.cos(angles)], axis=-1)                     # (L, D/2, 2)
    pe = pe.reshape(max_len, d_model).astype(dtype)                                 # (L, D)
    return pe[None, :, :]                                                           # (1, L, D)


# ---------------------------------------------------------------------------
# Kernel
# ---------------------------------------------------------------------------
def _add_pe_kernel(x_ref, pe_ref, o_ref):
    """o = x + pe, where pe's rows repeat every pe_ref.shape[0] rows of x."""
    x = x_ref[...]
    pe = pe_ref[...]
    if pe.shape[0] == 1:
        # Plain sublane broadcast (B >= sublane-tile path).
        o_ref[...] = x + pe
    else:
        # Folded small-batch path: pe block has r rows; replicate along the
        # sublane axis once per grid step (cheap, hidden under the HBM stream).
        reps = x.shape[0] // pe.shape[0]
        pe_full = jnp.concatenate([pe] * reps, axis=0) if reps > 1 else pe
        o_ref[...] = x + pe_full


# ---------------------------------------------------------------------------
# Tiling / chip heuristics
# ---------------------------------------------------------------------------
def _sublane(itemsize: int) -> int:
    # f32 -> 8, bf16 -> 16, int8/fp8 -> 32 rows per vreg sublane group.
    return max(8, 32 // max(1, itemsize))


@functools.lru_cache(maxsize=1)
def _chip_config():
    """Gen-gated (max_block_bytes, vmem_limit_bytes, two_cores)."""
    vmem_cap = None
    kind = ""
    try:
        vmem_cap = int(getattr(pltpu.get_tpu_info(), "vmem_capacity_bytes", 0)) or None
    except Exception:
        vmem_cap = None
    try:
        kind = jax.devices()[0].device_kind.lower()
    except Exception:
        kind = ""
    two_cores = ("v7" in kind) or ("7x" in kind)
    big_vmem = (vmem_cap is not None) and (vmem_cap >= 96 * 1024 * 1024)
    if big_vmem and not two_cores:
        # v5e / v6e: 128 MiB physical VMEM -> bigger blocks, fewer grid steps.
        return {"max_block_bytes": 8 << 20, "vmem_limit_bytes": 48 << 20,
                "two_cores": two_cores}
    # v7x (64 MiB / TC) or unknown chip: conservative settings, safe everywhere.
    return {"max_block_bytes": 4 << 20, "vmem_limit_bytes": 32 << 20,
            "two_cores": two_cores}


def _fold_factor(B: int, C: int, itemsize: int):
    """Smallest r with B*r >= sublane tile, r | C and (C/r) % 128 == 0.

    Returns 1 when no fold is needed, None when no valid fold exists
    (caller falls back to XLA's fused broadcast-add).
    """
    sub = _sublane(itemsize)
    if B >= sub:
        return 1
    r_min = -(-sub // B)
    r_max = min(C // _LANE, 8 * sub)
    for r in range(r_min, r_max + 1):
        if C % r == 0 and (C // r) % _LANE == 0:
            return r
    return None


def _choose_tiles(R: int, Cv: int, itemsize: int, r: int, cfg: dict):
    """(row_tile, col_tile) for the lane-dense (R, Cv) view (rows already sublane-dense)."""
    sub = _sublane(itemsize)
    max_block_bytes = cfg["max_block_bytes"]

    if r > 1:
        bt = R                                   # folded view: R = B*r is small; take all rows
    else:
        bt = R if R <= _ROW_TILE_CAP else _ROW_TILE_CAP

    max_cols = max(_LANE, (max_block_bytes // (bt * itemsize)) // _LANE * _LANE)
    ct = min(Cv, max_cols)

    # Only when the chip actually has 2 TensorCores (v7x) and the whole array
    # fits in one block: split so both cores get work.  Prefer splitting rows
    # (keeps full lane-width output tiles = biggest measured lever); fall back
    # to a column split, never below 128 lanes.
    if cfg["two_cores"] and bt == R and ct == Cv:
        if r == 1 and R >= 2 * sub and R % (2 * sub) == 0:
            bt = R // 2
        elif Cv >= 2 * _LANE:
            ct = (Cv // 2) // _LANE * _LANE
    return bt, ct


# ---------------------------------------------------------------------------
# Forward
# ---------------------------------------------------------------------------
def position_encoding_forward(x: jax.Array, pe: jax.Array, *,
                              donate: bool = False,
                              force_pallas: bool = False) -> jax.Array:
    """x: (B, max_len, d_model), pe: (1, max_len, d_model) -> x + pe.

    donate=True only adds input_output_aliases={0: 0} on the pallas_call; to
    actually reuse x's HBM buffer the *caller* must also donate x at the
    jax.jit boundary (donate_argnums).  Without that, XLA inserts a defensive
    copy and the "in-place" path is slower than the default -- so leave
    donate=False unless you control the jit boundary.
    """
    B, L, D = x.shape
    assert pe.shape == (1, L, D), (
        "forward requires seq_len == max_len (reproduces the PyTorch broadcast)")
    if pe.dtype != x.dtype:
        # Prefer building pe in the model dtype via make_position_encoding(dtype=...).
        pe = pe.astype(x.dtype)

    C = L * D
    itemsize = x.dtype.itemsize
    total_bytes = x.size * itemsize

    # Fallback: non-lane-dense flatten or tiny input -> let XLA emit (and fuse)
    # the broadcast-add; a standalone bandwidth-bound kernel cannot win there.
    if C % _LANE != 0 or (not force_pallas and total_bytes < _MIN_PALLAS_BYTES):
        return x + pe

    # Sublane-density fold: rows of the flat view must fill the 8/16/32-row
    # sublane tile or every vector store is masked (vst.msk) and v7x becomes
    # store-slot-bound.  r=1 means no fold needed; None means fall back.
    r = _fold_factor(B, C, itemsize)
    if r is None:
        return x + pe

    R, Cv = B * r, C // r
    x2 = x.reshape(R, Cv)      # lane-dense: Cv is a multiple of 128
    pe2 = pe.reshape(r, Cv)    # row k of pe2 pairs with rows {b*r + k} of x2

    cfg = _chip_config()
    bt, ct = _choose_tiles(R, Cv, itemsize, r, cfg)

    # Columns outer, rows inner: pe's block index (0, j) is constant across the
    # inner row loop, so its DMA is elided and pe moves ~exactly once overall.
    grid = (pl.cdiv(Cv, ct), pl.cdiv(R, bt))

    out2 = pl.pallas_call(
        _add_pe_kernel,
        out_shape=jax.ShapeDtypeStruct((R, Cv), x.dtype),
        grid_spec=pltpu.PrefetchScalarGridSpec(
            num_scalar_prefetch=0,
            grid=grid,
            in_specs=[
                pl.BlockSpec((bt, ct), lambda j, i: (i, j)),   # x tile
                pl.BlockSpec((r, ct), lambda j, i: (0, j)),    # pe tile (row-broadcast)
            ],
            out_specs=pl.BlockSpec((bt, ct), lambda j, i: (i, j)),
        ),
        compiler_params=pltpu.CompilerParams(
            dimension_semantics=("parallel", "parallel"),
            vmem_limit_bytes=cfg["vmem_limit_bytes"],
        ),
        cost_estimate=pl.CostEstimate(
            flops=B * C,
            transcendentals=0,
            bytes_accessed=2 * B * C * itemsize + C * itemsize,
        ),
        input_output_aliases={0: 0} if donate else {},
    )(x2, pe2)
    return out2.reshape(B, L, D)


# ---------------------------------------------------------------------------
# Demo / correctness check
# ---------------------------------------------------------------------------
if __name__ == "__main__":
    key = jax.random.PRNGKey(0)

    # 1) f32, small batch (B=2 < 8) -> sublane-fold Pallas path (forced past the
    #    tiny-input fallback).  Shapes consistent with forward: (B, max_len, d_model).
    batch, max_len, d_model = 2, 16, 32
    x = jax.random.normal(key, (batch, max_len, d_model), dtype=jnp.float32)
    pe = make_position_encoding(d_model=d_model, max_len=max_len, dtype=jnp.float32)
    ref = x + pe
    out = jax.block_until_ready(position_encoding_forward(x, pe, force_pallas=True))
    assert out.shape == (batch, max_len, d_model)
    assert jnp.allclose(out, ref, atol=1e-6, rtol=1e-6)

    # 2) bf16, jitted, pe built directly in the model dtype (no per-call cast),
    #    still the fold path (B=4 < 16 for bf16).
    xb = jax.random.normal(jax.random.PRNGKey(1), (4, max_len, d_model),
                           dtype=jnp.bfloat16)
    pe_bf = make_position_encoding(d_model=d_model, max_len=max_len, dtype=jnp.bfloat16)
    ref_bf = xb + pe_bf
    fwd = jax.jit(functools.partial(position_encoding_forward, force_pallas=True))
    out_bf = jax.block_until_ready(fwd(xb, pe_bf))
    assert out_bf.dtype == jnp.bfloat16
    assert jnp.allclose(out_bf.astype(jnp.float32), ref_bf.astype(jnp.float32), atol=1e-2)

    # 3) f32 with B >= 8 -> plain (no-fold) Pallas path, pe broadcast over sublanes.
    x_big = jax.random.normal(jax.random.PRNGKey(2), (16, max_len, d_model),
                              dtype=jnp.float32)
    out_big = jax.block_until_ready(position_encoding_forward(x_big, pe, force_pallas=True))
    assert jnp.allclose(out_big, x_big + pe, atol=1e-6, rtol=1e-6)

    # 4) Non-lane-dense flatten (L*D % 128 != 0) -> fused XLA broadcast-add fallback.
    d_small = 20
    x_s = jax.random.normal(jax.random.PRNGKey(3), (batch, max_len, d_small),
                            dtype=jnp.float32)
    pe_s = make_position_encoding(d_model=d_small, max_len=max_len)
    out_s = jax.block_until_ready(position_encoding_forward(x_s, pe_s))
    assert jnp.allclose(out_s, x_s + pe_s, atol=1e-6, rtol=1e-6)

    print("KERNEL_OK")
</pallas_src>

<mosaic_0001>
module attributes {stable_mosaic.version = 11 : i64} {
  func.func @_add_pe_kernel(%arg0: i32, %arg1: i32, %arg2: memref<8x128xf32, #tpu.memory_space<vmem>>, %arg3: memref<4x128xf32, #tpu.memory_space<vmem>>, %arg4: memref<8x128xf32, #tpu.memory_space<vmem>>) attributes {dimension_semantics = [#tpu.dimension_semantics<parallel>, #tpu.dimension_semantics<parallel>], iteration_bounds = array<i64: 1, 1>, scalar_prefetch = 0 : i64, scratch_operands = 0 : i64, tpu.core_type = #tpu.core_type<tc>, window_params = [{transform_indices = @transform_0, window_bounds = array<i64: 8, 128>}, {transform_indices = @transform_1, window_bounds = array<i64: 4, 128>}, {transform_indices = @transform_2, window_bounds = array<i64: 8, 128>}]} {
    %c0 = arith.constant 0 : index
    %c0_0 = arith.constant 0 : index
    %0 = vector.load %arg2[%c0, %c0_0] : memref<8x128xf32, #tpu.memory_space<vmem>>, vector<8x128xf32>
    %c0_1 = arith.constant 0 : index
    %c0_2 = arith.constant 0 : index
    %1 = vector.load %arg3[%c0_1, %c0_2] : memref<4x128xf32, #tpu.memory_space<vmem>>, vector<4x128xf32>
    %2 = tpu.concatenate %1, %1 in 0 : vector<4x128xf32>, vector<4x128xf32> -> vector<8x128xf32>
    %3 = arith.addf %0, %2 : vector<8x128xf32>
    %c0_3 = arith.constant 0 : index
    %c0_4 = arith.constant 0 : index
    %4 = vector.load %arg4[%c0_3, %c0_4] : memref<8x128xf32, #tpu.memory_space<vmem>>, vector<8x128xf32>
    tpu.vector_store %arg4[%c0_3, %c0_4], %3 {strides = array<i32>} : memref<8x128xf32, #tpu.memory_space<vmem>>, vector<8x128xf32>,
    return
  }
  func.func @transform_0(%arg0: i32, %arg1: i32) -> (i32, i32) {
    %c0_i32 = arith.constant 0 : i32
    return %arg1, %arg0 : i32, i32
  }
  func.func @transform_1(%arg0: i32, %arg1: i32) -> (i32, i32) {
    %c0_i32 = arith.constant 0 : i32
    %c0_i32_0 = arith.constant 0 : i32
    return %c0_i32, %arg0 : i32, i32
  }
  func.func @transform_2(%arg0: i32, %arg1: i32) -> (i32, i32) {
    %c0_i32 = arith.constant 0 : i32
    return %arg1, %arg0 : i32, i32
  }
}

</mosaic_0001>

<bundles_post_ra>
// kernel: tpu_custom_call.1
= control target key start
LH: loop header
LB: loop body
LE: loop exit
PB: predicated region body
PF: predicated region fallthrough
CT: control target
= control target key end

     0   :  { %7 = vsyncpa [#allocation3], 0  ;;  %s157_s0 = inlined_call_operand.hbm [shape: f32[8,128], index: 0, kind: input, shape index: {}]   ;;  %s158_s1 = inlined_call_operand.hbm [shape: f32[4,128], index: 1, kind: input, shape index: {}]   ;;  %s159_s2 = inlined_call_operand.hbm [shape: f32[8,128], index: 2, kind: output, shape index: {}]  }
   0x1   :  { %8 = vsyncpa [#allocation6], 0 }
   0x2   :  { %9 = vsyncpa [#allocation4], 0  ;;  %s130_s9 = smov [#allocation2]   ;;  %s131_s11 = smov [#allocation5]  }
   0x3   :  { %s16_s10 = sshll.u32 %s130_s9, 4  ;;  %s26_s12 = sshll.u32 %s131_s11, 4  ;;  %s17_s10 = int_to_ptr.vmem [resolvable:$true] %s16_s10  ;;  %s27_s12 = int_to_ptr.vmem [resolvable:$true] %s26_s12 }
   0x4   :  { %s72_s13 = scalar_lea.vmem %s17_s10, 128  ;;  %p77_p1 = scmp.lt.s32.totalorder %s17_s10, %s17_s10 }
   0x5   :  { %p73_p0 = scmp.ne.s32.totalorder %s17_s10, %s72_s13  ;;  %p78_p2 = scmp.lt.s32.totalorder %s72_s13, %s72_s13 }
   0x7   :  { %p79_p3 = por %p78_p2, %p77_p1 }
   0x9   :  { %p80_p4 = pnand %p79_p3, %p73_p0 }
   0xb   :  { %83 = shalt.err (!%p80_p4)
}
   0xc   :  { %19 = dma.hbm_to_vmem [thread:$0]  %s157_s0, 128, %s17_s10, [#allocation3]  }
   0xd   :  { %s92_s16 = scalar_lea.vmem %s27_s12, 64  ;;  %p97_p6 = scmp.lt.s32.totalorder %s27_s12, %s27_s12 }
   0xe   :  { %p93_p5 = scmp.ne.s32.totalorder %s27_s12, %s92_s16  ;;  %p98_p7 = scmp.lt.s32.totalorder %s92_s16, %s92_s16 }
  0x10   :  { %p99_p8 = por %p98_p7, %p97_p6 }
  0x12   :  { %p100_p9 = pnand %p99_p8, %p93_p5 }
  0x14   :  { %103 = shalt.err (!%p100_p9)
}
  0x15   :  { %29 = dma.hbm_to_vmem [thread:$0]  %s158_s1, 64, %s27_s12, [#allocation6]  }
  0x16   :  { %124 = dma.done.wait [#allocation3], 128  }
  0x17   :  { %125 = vsyncadd [#allocation3], 4294967168 }
  0x18   :  { %126 = dma.done.wait [#allocation6], 64  }
  0x19   :  { %127 = vsyncadd [#allocation6], 4294967232  ;;  %v37_v0 = vld [vmem:[#allocation5] sm:$0xf]  ;;  %vm41_vm0 = vcmask 1043456   ;;  %v36_v1 = vld [vmem:[#allocation2] sm:$0xff] }
  0x1a   :  { %v39_v2 = vrot.slane %v37_v0, 4  ;;  %s132_s0 = smov [#allocation7]  }
  0x1b   :  { %s51_s19 = sshll.u32 %s132_s0, 4  ;;  %s52_s19 = int_to_ptr.vmem [resolvable:$true] %s51_s19 }
  0x1c   :  { %v42_v3 = vsel %vm41_vm0, %v37_v0, %v39_v2  ;;  %s104_s20 = scalar_lea.vmem %s52_s19, 128  ;;  %p109_p11 = scmp.lt.s32.totalorder %s52_s19, %s52_s19 }
  0x1d   :  { %v43_v4 = vadd.f32 %v42_v3, %v36_v1  ;;  %p105_p10 = scmp.ne.s32.totalorder %s52_s19, %s104_s20  ;;  %p110_p12 = scmp.lt.s32.totalorder %s104_s20, %s104_s20 }
  0x1f   :  { %44 = vst [vmem:[#allocation7] sm:$0xff] %v43_v4  ;;  %p111_p13 = por %p110_p12, %p109_p11 }
  0x21   :  { %p112_p0 = pnand %p111_p13, %p105_p10 }
  0x23   :  { %115 = shalt.err (!%p112_p0)
}
  0x24   :  { %54 = dma.vmem_to_hbm [thread:$0]  %s52_s19, 128, %s159_s2, [#allocation4]  }
  0x25   :  { %128 = dma.done.wait [#allocation4], 128  }
  0x26   :  { %129 = vsyncadd [#allocation4], 4294967168 }
  0x27   :  { %58 = vsyncpa [#allocation3], 1 }
  0x28   :  { %59 = vsyncpa [#allocation6], 1 }
  0x29   :  { %60 = vsyncpa [#allocation4], 1 }

</bundles_post_ra>
